<compile_context>
chip_gen: v6e
topology: v6e:2x2x1
jax: 0.10.0
libtpu: 0.0.40
codegen_flags: <defaults>
</compile_context>

<pallas_src>
import functools
import math

import jax
import jax.numpy as jnp
from jax.experimental import pallas as pl
from jax.experimental.pallas import tpu as pltpu


def _round_up(x, m):
    return (x + m - 1) // m * m


# ---------------------------------------------------------------------------
# Kernel
# ---------------------------------------------------------------------------
def _film_kernel(x_ref, w_ref, b_ref, heads_ref, filmreg_ref, sq_acc,
                 *, H, din, r_in, r_film, r_pred1, r_heads,
                 total_rows, needs_mask):
    f32 = jnp.float32
    bf16 = jnp.bfloat16
    step = pl.program_id(0)

    @pl.when(step == 0)
    def _():
        sq_acc[...] = jnp.zeros_like(sq_acc)

    x = x_ref[...]                                             # (TB, din) bf16

    # fused p_layer/g_layer:  [p | g] = x @ blockdiag(wp, wg) + [bp | bg]
    pg = (jnp.dot(x, w_ref[r_in:r_in + din, :], preferred_element_type=f32)
          + b_ref[0:1, :])
    p = pg[:, :H]
    g = pg[:, H:]

    # fused FiLM:  [alpha | beta] = [p | g] @ [[wa2, wb2], [wa1, wb1]] + biases
    ab = (jnp.dot(pg.astype(bf16), w_ref[r_film:r_film + 2 * H, :],
                  preferred_element_type=f32)
          + b_ref[1:2, :])
    alpha = ab[:, :H]
    beta = ab[:, H:]

    # filmreg: accumulate per-column sums of squares across batch tiles.
    # The cross-lane reduce + sqrt run only once, in the final step.
    sq = ab * ab
    if needs_mask:
        tb = x_ref.shape[0]
        row = jax.lax.broadcasted_iota(jnp.int32, (tb, 1), 0)
        valid = total_rows - step * tb
        sq = sq * (row < valid).astype(f32)
    sq_acc[...] += jnp.sum(sq, axis=0, keepdims=True)

    g_mod = (alpha + 1.0) * g + beta

    # pred_layer1: single (TB, 4H) x (4H, H) matmul over the concatenation
    cat = jnp.concatenate([p, g_mod, g_mod - p, g_mod * p], axis=1).astype(bf16)
    y = (jnp.dot(cat, w_ref[r_pred1:r_pred1 + 4 * H, :H],
                 preferred_element_type=f32)
         + b_ref[2:3, :H])
    y = jnp.maximum(y, 0.0)

    # LayerNorm over hidden dim (PyTorch default eps = 1e-5, elementwise affine)
    mean = jnp.mean(y, axis=-1, keepdims=True)
    var_ln = jnp.mean((y - mean) ** 2, axis=-1, keepdims=True)
    y = (y - mean) * jax.lax.rsqrt(var_ln + 1e-5)
    y = y * b_ref[3:4, :H] + b_ref[4:5, :H]

    # fused heads: columns = [pred_mean | pred_var], single ReLU, single store
    heads = (jnp.dot(y.astype(bf16), w_ref[r_heads:r_heads + H, :2],
                     preferred_element_type=f32)
             + b_ref[5:6, :2])
    heads_ref[...] = jnp.maximum(heads, 0.0)

    @pl.when(step == pl.num_programs(0) - 1)
    def _():
        s = sq_acc[...]
        a2 = jnp.sum(s[:, :H], axis=1, keepdims=True)
        b2 = jnp.sum(s[:, H:], axis=1, keepdims=True)
        filmreg_ref[...] = jnp.sqrt(a2) + jnp.sqrt(b2)


# ---------------------------------------------------------------------------
# Host-side parameter packing
# ---------------------------------------------------------------------------
def pack_params(params, pattern_dim, graph_dim, hidden_dim):
    H = hidden_dim
    din = pattern_dim + graph_dim
    wcols = 2 * H
    f32 = jnp.float32

    # fused input layer: block-diagonal [[wp, 0], [0, wg]]  -> [p | g]
    w_in = jnp.zeros((din, 2 * H), f32)
    w_in = w_in.at[:pattern_dim, :H].set(params["wp"])
    w_in = w_in.at[pattern_dim:, H:].set(params["wg"])

    # fused FiLM: rows ordered like [p | g], cols ordered like [alpha | beta]
    w_film = jnp.zeros((2 * H, 2 * H), f32)
    w_film = w_film.at[:H, :H].set(params["wa2"])   # p -> alpha
    w_film = w_film.at[:H, H:].set(params["wb2"])   # p -> beta
    w_film = w_film.at[H:, :H].set(params["wa1"])   # g -> alpha
    w_film = w_film.at[H:, H:].set(params["wb1"])   # g -> beta

    w_pred1 = params["wpred1"]                                       # (4H, H)
    w_heads = jnp.concatenate([params["wmean"], params["wvar"]], 1)  # (H, 2)

    blocks = [w_in, w_film, w_pred1, w_heads]
    offsets = []
    rows = 0
    for blk in blocks:
        rows = _round_up(rows, 16)        # keep bf16 sublane-aligned row starts
        offsets.append(rows)
        rows += blk.shape[0]
    total_rows = _round_up(rows, 16)

    w_all = jnp.zeros((total_rows, wcols), f32)
    for off, blk in zip(offsets, blocks):
        w_all = w_all.at[off:off + blk.shape[0], :blk.shape[1]].set(blk)
    w_all = w_all.astype(jnp.bfloat16)    # bf16 weights, f32 accumulation on MXU

    def pad_row(v):
        v = v.reshape(1, -1)
        return jnp.pad(v, ((0, 0), (0, wcols - v.shape[1])))

    b_all = jnp.concatenate([
        pad_row(jnp.concatenate([params["bp"].reshape(-1),
                                 params["bg"].reshape(-1)])),
        pad_row(jnp.concatenate([(params["ba1"] + params["ba2"]).reshape(-1),
                                 (params["bb1"] + params["bb2"]).reshape(-1)])),
        pad_row(params["bpred1"].reshape(-1)),
        pad_row(params["ln_g"].reshape(-1)),
        pad_row(params["ln_b"].reshape(-1)),
        pad_row(jnp.concatenate([params["bmean"].reshape(-1),
                                 params["bvar"].reshape(-1)])),
    ], axis=0).astype(f32)

    return w_all, b_all, tuple(offsets)


# ---------------------------------------------------------------------------
# Wrapper
# ---------------------------------------------------------------------------
def film_sum_predict(pattern, graph, params, *, block_b=None):
    B, P = pattern.shape
    _, G = graph.shape
    H = params["ln_g"].shape[-1]
    din = P + G

    w_all, b_all, (r_in, r_film, r_pred1, r_heads) = pack_params(params, P, G, H)
    x_in = jnp.concatenate([pattern, graph], axis=1).astype(jnp.bfloat16)

    # batch tiling: sublane-aligned tile; ragged tail handled by zero-padding
    # the input and masking the filmreg contribution of the padded rows.
    if block_b is None:
        block_b = min(_round_up(B, 8), 512)
    block_b = _round_up(block_b, 8)
    B_pad = _round_up(B, block_b)
    if B_pad != B:
        x_in = jnp.pad(x_in, ((0, B_pad - B), (0, 0)))
    grid = (B_pad // block_b,)

    kernel = functools.partial(
        _film_kernel, H=H, din=din,
        r_in=r_in, r_film=r_film, r_pred1=r_pred1, r_heads=r_heads,
        total_rows=B, needs_mask=(B_pad != B))

    heads, filmreg = pl.pallas_call(
        kernel,
        out_shape=(
            jax.ShapeDtypeStruct((B_pad, 2), jnp.float32),   # [pred_mean | pred_var]
            jax.ShapeDtypeStruct((1, 1), jnp.float32),       # filmreg
        ),
        grid_spec=pltpu.PrefetchScalarGridSpec(
            num_scalar_prefetch=0,
            grid=grid,
            in_specs=[
                pl.BlockSpec((block_b, din), lambda i: (i, 0)),     # batch tile
                pl.BlockSpec(w_all.shape, lambda i: (0, 0)),        # weights resident
                pl.BlockSpec(b_all.shape, lambda i: (0, 0)),        # biases resident
            ],
            out_specs=(
                pl.BlockSpec((block_b, 2), lambda i: (i, 0)),
                pl.BlockSpec((1, 1), lambda i: (0, 0)),
            ),
            scratch_shapes=[
                pltpu.VMEM((1, 2 * H), jnp.float32),   # [sum(alpha^2)_col | sum(beta^2)_col]
            ],
        ),
        compiler_params=pltpu.CompilerParams(
            # the batch axis carries the filmreg reduction -> "arbitrary"
            dimension_semantics=("arbitrary",),
        ),
    )(x_in, w_all, b_all)

    y_mean = heads[:B, 0:1]
    y_var = heads[:B, 1:2]
    return y_mean, y_var, filmreg[0, 0]


# ---------------------------------------------------------------------------
# Synthetic parameters (FilmSumPredictNet shapes; non-zero biases so the
# bias-add and ragged-batch masking paths are actually exercised)
# ---------------------------------------------------------------------------
def init_params(key, pattern_dim, graph_dim, hidden_dim):
    ks = jax.random.split(key, 24)
    f32 = jnp.float32
    H = hidden_dim

    def normal_w(k, din, dout, std):
        return (std * jax.random.normal(k, (din, dout))).astype(f32)

    def xavier_w(k, din, dout):
        bound = math.sqrt(6.0 / (din + dout))
        return jax.random.uniform(k, (din, dout), minval=-bound, maxval=bound).astype(f32)

    def small_b(k, d):
        return (0.1 * jax.random.normal(k, (1, d))).astype(f32)

    std = 1.0 / math.sqrt(H)
    return {
        "wp": normal_w(ks[0], pattern_dim, H, std), "bp": small_b(ks[9], H),
        "wg": normal_w(ks[1], graph_dim, H, std), "bg": small_b(ks[10], H),
        "wa1": xavier_w(ks[2], H, H), "ba1": small_b(ks[11], H),
        "wa2": xavier_w(ks[3], H, H), "ba2": small_b(ks[12], H),
        "wb1": xavier_w(ks[4], H, H), "bb1": small_b(ks[13], H),
        "wb2": xavier_w(ks[5], H, H), "bb2": small_b(ks[14], H),
        "wpred1": normal_w(ks[6], 4 * H, H, std), "bpred1": small_b(ks[15], H),
        "ln_g": (1.0 + 0.1 * jax.random.normal(ks[16], (1, H))).astype(f32),
        "ln_b": small_b(ks[17], H),
        "wmean": xavier_w(ks[7], H, 1), "bmean": small_b(ks[18], 1),
        "wvar": xavier_w(ks[8], H, 1), "bvar": small_b(ks[19], 1),
    }


# ---------------------------------------------------------------------------
# Pure-JAX reference (weight_dtype mirrors the kernel's bf16 weight cast)
# ---------------------------------------------------------------------------
def reference_forward(pattern, graph, params, weight_dtype=jnp.float32):
    def w(name):
        return params[name].astype(weight_dtype).astype(jnp.float32)

    p = pattern @ w("wp") + params["bp"]
    g = graph @ w("wg") + params["bg"]
    alpha = g @ w("wa1") + params["ba1"] + p @ w("wa2") + params["ba2"]
    beta = g @ w("wb1") + params["bb1"] + p @ w("wb2") + params["bb2"]
    gm = (alpha + 1.0) * g + beta
    cat = jnp.concatenate([p, gm, gm - p, gm * p], axis=1)
    y = jnp.maximum(cat @ w("wpred1") + params["bpred1"], 0.0)
    mean = jnp.mean(y, axis=-1, keepdims=True)
    var_ln = jnp.mean((y - mean) ** 2, axis=-1, keepdims=True)
    y = (y - mean) / jnp.sqrt(var_ln + 1e-5) * params["ln_g"] + params["ln_b"]
    y_mean = jnp.maximum(y @ w("wmean") + params["bmean"], 0.0)
    y_var = jnp.maximum(y @ w("wvar") + params["bvar"], 0.0)
    filmreg = jnp.sqrt(jnp.sum(alpha ** 2)) + jnp.sqrt(jnp.sum(beta ** 2))
    return y_mean, y_var, filmreg


if __name__ == "__main__":
    # B intentionally not a multiple of 8 to exercise the ragged-batch masking.
    B, pattern_dim, graph_dim, hidden_dim = 10, 24, 40, 32

    key = jax.random.PRNGKey(0)
    k_pat, k_graph, k_params = jax.random.split(key, 3)
    pattern = jax.random.normal(k_pat, (B, pattern_dim), dtype=jnp.float32)
    graph = jax.random.normal(k_graph, (B, graph_dim), dtype=jnp.float32)
    params = init_params(k_params, pattern_dim, graph_dim, hidden_dim)

    y, var, filmreg = film_sum_predict(pattern, graph, params)
    jax.block_until_ready((y, var, filmreg))

    # reference with the same bf16 weight / input quantisation as the kernel
    pat_q = pattern.astype(jnp.bfloat16).astype(jnp.float32)
    gr_q = graph.astype(jnp.bfloat16).astype(jnp.float32)
    y_ref, var_ref, film_ref = reference_forward(
        pat_q, gr_q, params, weight_dtype=jnp.bfloat16)

    assert y.shape == (B, 1) and var.shape == (B, 1)
    assert jnp.allclose(y, y_ref, atol=5e-2, rtol=5e-2)
    assert jnp.allclose(var, var_ref, atol=5e-2, rtol=5e-2)
    assert jnp.allclose(filmreg, film_ref, atol=5e-2, rtol=5e-2)

    print("KERNEL_OK")
</pallas_src>

<mosaic_0001>
module attributes {stable_mosaic.version = 11 : i64} {
  func.func @_film_kernel(%arg0: i32, %arg1: memref<16x64xbf16, #tpu.memory_space<vmem>>, %arg2: memref<288x64xbf16, #tpu.memory_space<vmem>>, %arg3: memref<6x64xf32, #tpu.memory_space<vmem>>, %arg4: memref<16x2xf32, #tpu.memory_space<vmem>>, %arg5: memref<1x1xf32, #tpu.memory_space<vmem>>, %arg6: memref<1x64xf32, #tpu.memory_space<vmem>>) attributes {dimension_semantics = [#tpu.dimension_semantics<arbitrary>], iteration_bounds = array<i64: 1>, scalar_prefetch = 0 : i64, scratch_operands = 1 : i64, tpu.core_type = #tpu.core_type<tc>, window_params = [{transform_indices = @transform_0, window_bounds = array<i64: 16, 64>}, {pipeline_mode = #tpu.pipeline_mode<synchronous>, transform_indices = @transform_1, window_bounds = array<i64: 288, 64>}, {pipeline_mode = #tpu.pipeline_mode<synchronous>, transform_indices = @transform_2, window_bounds = array<i64: 6, 64>}, {transform_indices = @transform_3, window_bounds = array<i64: 16, 2>}, {pipeline_mode = #tpu.pipeline_mode<synchronous>, transform_indices = @transform_4, window_bounds = array<i64: 1, 1>}]} {
    %c0_i32 = arith.constant 0 : i32
    %0 = arith.cmpi eq, %arg0, %c0_i32 : i32
    %1 = arith.extui %0 : i1 to i32
    %c0_i32_0 = arith.constant 0 : i32
    %2 = arith.cmpi ne, %1, %c0_i32_0 : i32
    scf.if %2 {
      %cst_34 = arith.constant 0.000000e+00 : f32
      %85 = vector.broadcast %cst_34 : f32 to vector<1x64xf32>
      %c0_35 = arith.constant 0 : index
      %c0_36 = arith.constant 0 : index
      %86 = vector.load %arg6[%c0_35, %c0_36] : memref<1x64xf32, #tpu.memory_space<vmem>>, vector<1x64xf32>
      tpu.vector_store %arg6[%c0_35, %c0_36], %85 {strides = array<i32>} : memref<1x64xf32, #tpu.memory_space<vmem>>, vector<1x64xf32>,
    } else {
    }
    %c0 = arith.constant 0 : index
    %c0_1 = arith.constant 0 : index
    %3 = vector.load %arg1[%c0, %c0_1] : memref<16x64xbf16, #tpu.memory_space<vmem>>, vector<16x64xbf16>
    %c0_2 = arith.constant 0 : index
    %c0_3 = arith.constant 0 : index
    %4 = vector.load %arg2[%c0_2, %c0_3] : memref<288x64xbf16, #tpu.memory_space<vmem>>, vector<64x64xbf16>
    %cst = arith.constant dense<0.000000e+00> : vector<16x64xf32>
    %5 = tpu.matmul %3, %4, %cst {dimension_numbers = #tpu.dot_dimension_numbers<[1], [0], [0], [1], [0, 0, 1, 1], [], []>} : vector<16x64xbf16>, vector<64x64xbf16>, vector<16x64xf32> -> vector<16x64xf32>
    %c0_4 = arith.constant 0 : index
    %c0_5 = arith.constant 0 : index
    %6 = vector.load %arg3[%c0_4, %c0_5] : memref<6x64xf32, #tpu.memory_space<vmem>>, vector<1x64xf32>
    %7 = vector.broadcast %6 : vector<1x64xf32> to vector<16x64xf32>
    %8 = arith.addf %5, %7 : vector<16x64xf32>
    %9 = vector.extract_strided_slice %8 {offsets = [0, 0], sizes = [16, 32], strides = [1, 1]} : vector<16x64xf32> to vector<16x32xf32>
    %10 = vector.extract_strided_slice %8 {offsets = [0, 32], sizes = [16, 32], strides = [1, 1]} : vector<16x64xf32> to vector<16x32xf32>
    %11 = arith.truncf %8 : vector<16x64xf32> to vector<16x64xbf16>
    %c64 = arith.constant 64 : index
    %c0_6 = arith.constant 0 : index
    %12 = vector.load %arg2[%c64, %c0_6] : memref<288x64xbf16, #tpu.memory_space<vmem>>, vector<64x64xbf16>
    %cst_7 = arith.constant dense<0.000000e+00> : vector<16x64xf32>
    %13 = tpu.matmul %11, %12, %cst_7 {dimension_numbers = #tpu.dot_dimension_numbers<[1], [0], [0], [1], [0, 0, 1, 1], [], []>} : vector<16x64xbf16>, vector<64x64xbf16>, vector<16x64xf32> -> vector<16x64xf32>
    %c1 = arith.constant 1 : index
    %c0_8 = arith.constant 0 : index
    %14 = vector.load %arg3[%c1, %c0_8] : memref<6x64xf32, #tpu.memory_space<vmem>>, vector<1x64xf32>
    %15 = vector.broadcast %14 : vector<1x64xf32> to vector<16x64xf32>
    %16 = arith.addf %13, %15 : vector<16x64xf32>
    %17 = vector.extract_strided_slice %16 {offsets = [0, 0], sizes = [16, 32], strides = [1, 1]} : vector<16x64xf32> to vector<16x32xf32>
    %18 = vector.extract_strided_slice %16 {offsets = [0, 32], sizes = [16, 32], strides = [1, 1]} : vector<16x64xf32> to vector<16x32xf32>
    %19 = arith.mulf %16, %16 : vector<16x64xf32>
    %20 = tpu.iota {dimensions = array<i32: 0>} : vector<16x1xi32>
    %c16_i32 = arith.constant 16 : i32
    %21 = arith.muli %arg0, %c16_i32 : i32
    %c10_i32 = arith.constant 10 : i32
    %22 = arith.subi %c10_i32, %21 : i32
    %23 = vector.broadcast %22 : i32 to vector<16x1xi32>
    %24 = arith.cmpi slt, %20, %23 : vector<16x1xi32>
    %25 = arith.extui %24 : vector<16x1xi1> to vector<16x1xi32>
    %26 = arith.sitofp %25 : vector<16x1xi32> to vector<16x1xf32>
    %27 = vector.broadcast %26 : vector<16x1xf32> to vector<16x64xf32>
    %28 = arith.mulf %19, %27 : vector<16x64xf32>
    %c0_9 = arith.constant 0 : index
    %c0_10 = arith.constant 0 : index
    %29 = vector.load %arg6[%c0_9, %c0_10] : memref<1x64xf32, #tpu.memory_space<vmem>>, vector<1x64xf32>
    %cst_11 = arith.constant dense<0.000000e+00> : vector<64xf32>
    %30 = vector.multi_reduction <add>, %28, %cst_11 [0] : vector<16x64xf32> to vector<64xf32>
    %31 = vector.shape_cast %30 : vector<64xf32> to vector<1x64xf32>
    %32 = arith.addf %29, %31 : vector<1x64xf32>
    %c0_12 = arith.constant 0 : index
    %c0_13 = arith.constant 0 : index
    %33 = vector.load %arg6[%c0_12, %c0_13] : memref<1x64xf32, #tpu.memory_space<vmem>>, vector<1x64xf32>
    tpu.vector_store %arg6[%c0_12, %c0_13], %32 {strides = array<i32>} : memref<1x64xf32, #tpu.memory_space<vmem>>, vector<1x64xf32>,
    %cst_14 = arith.constant 1.000000e+00 : f32
    %34 = vector.broadcast %cst_14 : f32 to vector<16x32xf32>
    %35 = arith.addf %17, %34 : vector<16x32xf32>
    %36 = arith.mulf %35, %10 : vector<16x32xf32>
    %37 = arith.addf %36, %18 : vector<16x32xf32>
    %38 = arith.subf %37, %9 : vector<16x32xf32>
    %39 = arith.mulf %37, %9 : vector<16x32xf32>
    %40 = tpu.concatenate %9, %37, %38, %39 in 1 : vector<16x32xf32>, vector<16x32xf32>, vector<16x32xf32>, vector<16x32xf32> -> vector<16x128xf32>
    %41 = arith.truncf %40 : vector<16x128xf32> to vector<16x128xbf16>
    %c128 = arith.constant 128 : index
    %c0_15 = arith.constant 0 : index
    %42 = vector.load %arg2[%c128, %c0_15] : memref<288x64xbf16, #tpu.memory_space<vmem>>, vector<128x32xbf16>
    %cst_16 = arith.constant dense<0.000000e+00> : vector<16x32xf32>
    %43 = tpu.matmul %41, %42, %cst_16 {dimension_numbers = #tpu.dot_dimension_numbers<[1], [0], [0], [1], [0, 0, 1, 1], [], []>} : vector<16x128xbf16>, vector<128x32xbf16>, vector<16x32xf32> -> vector<16x32xf32>
    %c2 = arith.constant 2 : index
    %c0_17 = arith.constant 0 : index
    %44 = vector.load %arg3[%c2, %c0_17] : memref<6x64xf32, #tpu.memory_space<vmem>>, vector<1x32xf32>
    %45 = vector.broadcast %44 : vector<1x32xf32> to vector<16x32xf32>
    %46 = arith.addf %43, %45 : vector<16x32xf32>
    %cst_18 = arith.constant 0.000000e+00 : f32
    %47 = vector.broadcast %cst_18 : f32 to vector<16x32xf32>
    %48 = arith.maximumf %46, %47 : vector<16x32xf32>
    %cst_19 = arith.constant dense<0.000000e+00> : vector<16xf32>
    %49 = vector.multi_reduction <add>, %48, %cst_19 [1] : vector<16x32xf32> to vector<16xf32>
    %50 = vector.shape_cast %49 : vector<16xf32> to vector<16x1xf32>
    %cst_20 = arith.constant 3.200000e+01 : f32
    %51 = vector.broadcast %cst_20 : f32 to vector<16x1xf32>
    %52 = arith.divf %50, %51 : vector<16x1xf32>
    %53 = vector.broadcast %52 : vector<16x1xf32> to vector<16x32xf32>
    %54 = arith.subf %48, %53 : vector<16x32xf32>
    %55 = arith.mulf %54, %54 : vector<16x32xf32>
    %cst_21 = arith.constant dense<0.000000e+00> : vector<16xf32>
    %56 = vector.multi_reduction <add>, %55, %cst_21 [1] : vector<16x32xf32> to vector<16xf32>
    %57 = vector.shape_cast %56 : vector<16xf32> to vector<16x1xf32>
    %cst_22 = arith.constant 3.200000e+01 : f32
    %58 = vector.broadcast %cst_22 : f32 to vector<16x1xf32>
    %59 = arith.divf %57, %58 : vector<16x1xf32>
    %60 = vector.broadcast %52 : vector<16x1xf32> to vector<16x32xf32>
    %61 = arith.subf %48, %60 : vector<16x32xf32>
    %cst_23 = arith.constant 9.99999974E-6 : f32
    %62 = vector.broadcast %cst_23 : f32 to vector<16x1xf32>
    %63 = arith.addf %59, %62 : vector<16x1xf32>
    %64 = math.rsqrt %63 : vector<16x1xf32>
    %65 = vector.broadcast %64 : vector<16x1xf32> to vector<16x32xf32>
    %66 = arith.mulf %61, %65 : vector<16x32xf32>
    %c3 = arith.constant 3 : index
    %c0_24 = arith.constant 0 : index
    %67 = vector.load %arg3[%c3, %c0_24] : memref<6x64xf32, #tpu.memory_space<vmem>>, vector<1x32xf32>
    %68 = vector.broadcast %67 : vector<1x32xf32> to vector<16x32xf32>
    %69 = arith.mulf %66, %68 : vector<16x32xf32>
    %c4 = arith.constant 4 : index
    %c0_25 = arith.constant 0 : index
    %70 = vector.load %arg3[%c4, %c0_25] : memref<6x64xf32, #tpu.memory_space<vmem>>, vector<1x32xf32>
    %71 = vector.broadcast %70 : vector<1x32xf32> to vector<16x32xf32>
    %72 = arith.addf %69, %71 : vector<16x32xf32>
    %73 = arith.truncf %72 : vector<16x32xf32> to vector<16x32xbf16>
    %c256 = arith.constant 256 : index
    %c0_26 = arith.constant 0 : index
    %74 = vector.load %arg2[%c256, %c0_26] : memref<288x64xbf16, #tpu.memory_space<vmem>>, vector<32x2xbf16>
    %cst_27 = arith.constant dense<0.000000e+00> : vector<16x2xf32>
    %75 = tpu.matmul %73, %74, %cst_27 {dimension_numbers = #tpu.dot_dimension_numbers<[1], [0], [0], [1], [0, 0, 1, 1], [], []>} : vector<16x32xbf16>, vector<32x2xbf16>, vector<16x2xf32> -> vector<16x2xf32>
    %c5 = arith.constant 5 : index
    %c0_28 = arith.constant 0 : index
    %76 = vector.load %arg3[%c5, %c0_28] : memref<6x64xf32, #tpu.memory_space<vmem>>, vector<1x2xf32>
    %77 = vector.broadcast %76 : vector<1x2xf32> to vector<16x2xf32>
    %78 = arith.addf %75, %77 : vector<16x2xf32>
    %cst_29 = arith.constant 0.000000e+00 : f32
    %79 = vector.broadcast %cst_29 : f32 to vector<16x2xf32>
    %80 = arith.maximumf %78, %79 : vector<16x2xf32>
    %c0_30 = arith.constant 0 : index
    %c0_31 = arith.constant 0 : index
    %81 = vector.load %arg4[%c0_30, %c0_31] : memref<16x2xf32, #tpu.memory_space<vmem>>, vector<16x2xf32>
    tpu.vector_store %arg4[%c0_30, %c0_31], %80 {strides = array<i32>} : memref<16x2xf32, #tpu.memory_space<vmem>>, vector<16x2xf32>,
    %c0_i32_32 = arith.constant 0 : i32
    %82 = arith.cmpi eq, %arg0, %c0_i32_32 : i32
    %83 = arith.extui %82 : i1 to i32
    %c0_i32_33 = arith.constant 0 : i32
    %84 = arith.cmpi ne, %83, %c0_i32_33 : i32
    scf.if %84 {
      %c0_34 = arith.constant 0 : index
      %c0_35 = arith.constant 0 : index
      %85 = vector.load %arg6[%c0_34, %c0_35] : memref<1x64xf32, #tpu.memory_space<vmem>>, vector<1x64xf32>
      %86 = vector.extract_strided_slice %85 {offsets = [0, 0], sizes = [1, 32], strides = [1, 1]} : vector<1x64xf32> to vector<1x32xf32>
      %cst_36 = arith.constant dense<0.000000e+00> : vector<1xf32>
      %87 = vector.multi_reduction <add>, %86, %cst_36 [1] : vector<1x32xf32> to vector<1xf32>
      %88 = vector.shape_cast %87 : vector<1xf32> to vector<1x1xf32>
      %89 = vector.extract_strided_slice %85 {offsets = [0, 32], sizes = [1, 32], strides = [1, 1]} : vector<1x64xf32> to vector<1x32xf32>
      %cst_37 = arith.constant dense<0.000000e+00> : vector<1xf32>
      %90 = vector.multi_reduction <add>, %89, %cst_37 [1] : vector<1x32xf32> to vector<1xf32>
      %91 = vector.shape_cast %90 : vector<1xf32> to vector<1x1xf32>
      %92 = math.sqrt %88 : vector<1x1xf32>
      %93 = math.sqrt %91 : vector<1x1xf32>
      %94 = arith.addf %92, %93 : vector<1x1xf32>
      %c0_38 = arith.constant 0 : index
      %c0_39 = arith.constant 0 : index
      %95 = vector.load %arg5[%c0_38, %c0_39] : memref<1x1xf32, #tpu.memory_space<vmem>>, vector<1x1xf32>
      tpu.vector_store %arg5[%c0_38, %c0_39], %94 {strides = array<i32>} : memref<1x1xf32, #tpu.memory_space<vmem>>, vector<1x1xf32>,
    } else {
    }
    return
  }
  func.func @transform_0(%arg0: i32) -> (i32, i32) {
    %c0_i32 = arith.constant 0 : i32
    %c0_i32_0 = arith.constant 0 : i32
    return %arg0, %c0_i32 : i32, i32
  }
  func.func @transform_1(%arg0: i32) -> (i32, i32) {
    %c0_i32 = arith.constant 0 : i32
    %c0_i32_0 = arith.constant 0 : i32
    %c0_i32_1 = arith.constant 0 : i32
    return %c0_i32, %c0_i32_0 : i32, i32
  }
  func.func @transform_2(%arg0: i32) -> (i32, i32) {
    %c0_i32 = arith.constant 0 : i32
    %c0_i32_0 = arith.constant 0 : i32
    %c0_i32_1 = arith.constant 0 : i32
    return %c0_i32, %c0_i32_0 : i32, i32
  }
  func.func @transform_3(%arg0: i32) -> (i32, i32) {
    %c0_i32 = arith.constant 0 : i32
    %c0_i32_0 = arith.constant 0 : i32
    return %arg0, %c0_i32 : i32, i32
  }
  func.func @transform_4(%arg0: i32) -> (i32, i32) {
    %c0_i32 = arith.constant 0 : i32
    %c0_i32_0 = arith.constant 0 : i32
    %c0_i32_1 = arith.constant 0 : i32
    return %c0_i32, %c0_i32_0 : i32, i32
  }
}

</mosaic_0001>

<bundles_post_ra>
// kernel: tpu_custom_call.1
= control target key start
LH: loop header
LB: loop body
LE: loop exit
PB: predicated region body
PF: predicated region fallthrough
CT: control target
= control target key end

     0   :  { %v734_v1 = vmov 0.0   ;;  %vm735_vm0 = vmmov 0   ;;  %vm68_vm1 = vcmask 523264   ;;  %s918_s0 = inlined_call_operand.vmem [shape: bf16[16,64], index: 0, kind: input, shape index: {}]   ;;  %s919_s1 = inlined_call_operand.vmem [shape: bf16[288,64], index: 1, kind: input, shape index: {}]   ;;  %s920_s2 = inlined_call_operand.vmem [shape: f32[6,64], index: 2, kind: input, shape index: {}]   ;;  %s921_s3 = inlined_call_operand.vmem [shape: f32[16,2], index: 3, kind: output, shape index: {0}]   ;;  %s922_s4 = inlined_call_operand.hbm [shape: f32[1,1], index: 4, kind: output, shape index: {1}]  }
   0x1   :  { %v685_v0 = vld [vmem:[%s919_s1 + $0x18] sm:$0xff]   ;;  %612 = vmatprep.subr.bf16.mxu1 %v734_v1  ;;  %636 = vmatprep.subr.bf16.mxu0 %v734_v1  ;;  %v686_v2 = vld [vmem:[%s919_s1 + $0x10] sm:$0xff]   ;;  %v687_v3 = vld [vmem:[%s919_s1 + $0x8] sm:$0xff]  }
   0x2   :  { %613 = vmatpush3.bf16.msra.mxu1 %v685_v0  ;;  %620 = vmatprep.mubr.msk.bf16.mxu1 %vm735_vm0, %v734_v1  ;;  %v688_v4 = vld [vmem:[%s919_s1] sm:$0xff]   ;;  %v690_v6 = vld [vmem:[%s919_s1 + $0x38] sm:$0xff]  }
   0x3   :  { %614 = vmatprep.subr.bf16.mxu1 %v734_v1  ;;  %652 = vmatprep.mubr.msk.bf16.mxu0 %vm735_vm0, %v734_v1  ;;  %v689_v5 = vld [vmem:[%s918_s0] sm:$0xff]  }
   0x6   :  { %615 = vmatpush3.bf16.msra.mxu1 %v686_v2 }
   0x7   :  { %616 = vmatprep.subr.bf16.mxu1 %v734_v1 }
   0xa   :  { %617 = vmatpush3.bf16.msra.mxu1 %v687_v3 }
   0xb   :  { %618 = vmatprep.subr.bf16.mxu1 %v734_v1 }
   0xe   :  { %619 = vmatpush3.bf16.msra.mxu1 %v688_v4 }
   0xf   :  { %624 = vmatprep.subr.bf16.mxu1 %v734_v1 }
  0x10   :  { %10 = vsyncpa [#allocation4], 0  ;;  %v691_v7 = vld [vmem:[%s919_s1 + $0x30] sm:$0xff]   ;;  %v692_v8 = vld [vmem:[%s919_s1 + $0x28] sm:$0xff]   ;;  %s736_s8 = smov 96   ;;  %vm22_vm2 = vcmask 516096   ;;  %v197_v18 = vlaneseq }
  0x11   :  { %621 = vmatmul.mubr.msk.bf16.vlgmr.msra.gmra.mxu1 %vm68_vm1, %v689_v5  ;;  %v693_v9 = vld [vmem:[%s919_s1 + $0x20] sm:$0xff]   ;;  %23 = vst.msk [vmem:[#allocation2] sm:$0x1] %vm22_vm2, %v734_v1  ;;  %v694_v25 = vld [vmem:[%s919_s1 + $0x78] sm:$0xff]   ;;  %v695_v27 = vld [vmem:[%s919_s1 + $0x70] sm:$0xff]   ;;  %s737_s27 = smov 32  }
  0x12   :  { %625 = vmatpush3.bf16.msra.mxu1 %v690_v6  ;;  %632 = vmatprep.mubr.msk.bf16.mxu1 %vm735_vm0, %v734_v1  ;;  %v561_v10 = vld [vmem:[%s920_s2] ss:$0 sm:$0xff]  ;;  %v827_v19 = vshrl.u32 %v197_v18, 7  ;;  %v568_v20 = vld [vmem:[%s920_s2 + $0x1] ss:$0 sm:$0xff]  ;;  %v696_v33 = vld [vmem:[%s919_s1 + $0x68] sm:$0xff]  }
  0x13   :  { %626 = vmatprep.subr.bf16.mxu1 %v734_v1  ;;  %637 = vmatpush3.bf16.msra.mxu0 %v694_v25  ;;  %v697_v37 = vld [vmem:[%s919_s1 + $0x60] sm:$0xff]   ;;  %v698_v40 = vld [vmem:[%s919_s1 + $0x58] sm:$0xff]   ;;  %v699_v43 = vld [vmem:[%s919_s1 + $0x50] sm:$0xff]   ;;  %s738_s28 = smov 64   ;;  %vm274_vm4 = vcmask 261120   ;;  %vm279_vm5 = vcmask 785408  }
  0x14   :  { %v199_v21 = vadd.s32 8, %v827_v19  ;;  %638 = vmatprep.subr.bf16.mxu0 %v734_v1  ;;  %v700_v51 = vld [vmem:[%s919_s1 + $0x48] sm:$0xff]   ;;  %v701_v55 = vld [vmem:[%s919_s1 + $0x40] sm:$0xff]   ;;  %vm511_vm6 = vcmask 253952   ;;  %s739_s11 = smov [#allocation3]   ;;  %vm541_vm11 = vcmask 0  }
  0x15   :  { %s551_s12 = sshll.u32 %s739_s11, 4  ;;  %s552_s12 = int_to_ptr.vmem [resolvable:$true] %s551_s12 }
  0x16   :  { %627 = vmatpush3.bf16.msra.mxu1 %v691_v7  ;;  %vm204_vm3 = vcmp.lt.s32.totalorder %v199_v21, 10  ;;  %s712_s13 = scalar_lea.vmem %s552_s12, 16  ;;  %s716_s14 = scalar_lea.vmem %s552_s12, 32 }
  0x17   :  { %628 = vmatprep.subr.bf16.mxu1 %v734_v1  ;;  %v574_v30 = vsel %vm204_vm3, 1.0, %v734_v1  ;;  %639 = vmatpush3.bf16.msra.mxu0 %v695_v27  ;;  %p713_p0 = scmp.ne.s32.totalorder %s552_s12, %s712_s13  ;;  %p717_p1 = scmp.lt.s32.totalorder %s552_s12, %s552_s12 }
  0x18   :  { %640 = vmatprep.subr.bf16.mxu0 %v734_v1  ;;  %v211_v46 = vld [vmem:[#allocation2] sm:$0x1]  ;;  %p718_p2 = scmp.lt.s32.totalorder %s716_s14, %s712_s13 }
  0x1a   :  { %629 = vmatpush3.bf16.msra.mxu1 %v692_v8  ;;  %p719_p3 = por %p718_p2, %p717_p1 }
  0x1b   :  { %630 = vmatprep.subr.bf16.mxu1 %v734_v1  ;;  %641 = vmatpush3.bf16.msra.mxu0 %v696_v33 }
  0x1c   :  { %642 = vmatprep.subr.bf16.mxu0 %v734_v1  ;;  %p720_p4 = pnand %p719_p3, %p713_p0 }
  0x1e   :  { %631 = vmatpush3.bf16.msra.mxu1 %v693_v9 }
  0x1f   :  { %656 = vmatprep.subr.bf16.mxu1 %v734_v1  ;;  %643 = vmatpush3.bf16.msra.mxu0 %v697_v37 }
  0x20   :  { %644 = vmatprep.subr.bf16.mxu0 %v734_v1 }
  0x23   :  { %645 = vmatpush3.bf16.msra.mxu0 %v698_v40 }
  0x24   :  { %646 = vmatprep.subr.bf16.mxu0 %v734_v1 }
  0x27   :  { %647 = vmatpush3.bf16.msra.mxu0 %v699_v43 }
  0x28   :  { %648 = vmatprep.subr.bf16.mxu0 %v734_v1 }
  0x2b   :  { %649 = vmatpush3.bf16.msra.mxu0 %v700_v51 }
  0x2c   :  { %650 = vmatprep.subr.bf16.mxu0 %v734_v1 }
  0x2f   :  { %651 = vmatpush3.bf16.msra.mxu0 %v701_v55 }
  0xd1   :  { %v106_v11 = vpop.f32.mrf.mxu1 }
  0xd2   :  { %v812_v12 = vadd.f32 %v561_v10, %v106_v11 }
  0xd3   :  { %v622_v13 = vpop.f32.mrf.mxu1 }
  0xd4   :  { %228 = vrot.lane.b32.xlu0 %v812_v12, %s736_s8 }
  0xd5   :  { %v109_v14 = vpop.f32.mrf.mxu1 }
  0xd6   :  { %v816_v15 = vadd.f32 %v561_v10, %v109_v14 }
  0xd7   :  { %v623_v16 = vpop.f32.mrf.mxu1 }
  0xd8   :  { %230 = vrot.lane.b32.xlu0 %v816_v15, %s736_s8  ;;  %v113_v17 = vpack.c.bf16 %v816_v15, %v812_v12 }
  0xda   :  { %633 = vmatmul.mubr.msk.bf16.vlgmr.msra.gmra.mxu1 %vm68_vm1, %v113_v17 }
  0xdb   :  { %660 = vmatprep.mubr.msk.bf16.mxu1 %vm735_vm0, %v734_v1 }
 0x146   :  { %v229_v49 = vpop.permute.xlu0 %228 }
 0x14a   :  { %v231_v56 = vpop.permute.xlu0 %230 }
 0x19a   :  { %v188_v22 = vpop.f32.mrf.mxu1 }
 0x19b   :  { %v189_v23 = vadd.f32 %v568_v20, %v188_v22 }
 0x19c   :  { %v634_v24 = vpop.f32.mrf.mxu1 }
 0x19d   :  { %238 = vrot.lane.b32.xlu1 %v189_v23, %s736_s8  ;;  %v195_v31 = vmul.f32 %v189_v23, %v189_v23  ;;  %v224_v50 = vadd.f32 1.0, %v189_v23 }
 0x19e   :  { %v191_v26 = vpop.f32.mrf.mxu1 }
 0x19f   :  { %v192_v28 = vadd.f32 %v568_v20, %v191_v26  ;;  %v212_v35 = vsel %vm68_vm1, %v195_v31, 0.0  ;;  %v234_v54 = vmul.f32 %v229_v49, %v224_v50 }
 0x1a0   :  { %v635_v29 = vpop.f32.mrf.mxu1 }
 0x1a1   :  { %v196_v32 = vmul.f32 %v192_v28, %v192_v28  ;;  %240 = vrot.lane.b32.xlu1 %v192_v28, %s736_s8  ;;  %v225_v52 = vadd.f32 1.0, %v192_v28 }
 0x1a3   :  { %v210_v34 = vmul.f32 %v574_v30, %v196_v32  ;;  %v235_v58 = vmul.f32 %v231_v56, %v225_v52 }
 0x1a5   :  { %v213_v36 = vsel %vm68_vm1, %v210_v34, 0.0 }
 0x1a6   :  { %v214_v38 = vadd.f32 %v213_v36, %v212_v35 }
 0x1a8   :  { %v215_v39 = vrot.slane %v214_v38, 4 }
 0x1aa   :  { %v216_v41 = vadd.f32 %v215_v39, %v214_v38 }
 0x1ac   :  { %v217_v42 = vrot.slane %v216_v41, 2 }
 0x1ae   :  { %v218_v44 = vadd.f32 %v217_v42, %v216_v41 }
 0x1b0   :  { %v219_v45 = vrot.slane %v218_v44, 1 }
 0x1b2   :  { %v220_v47 = vadd.f32 %v219_v45, %v218_v44  ;;  %v518_v45 = vsub.s32 0, %v827_v19 }
 0x1b4   :  { %v221_v48 = vadd.f32 %v220_v47, %v211_v46  ;;  %v702_v47 = vld [vmem:[%s919_s1 + $0x88] sm:$0xff]  }
 0x1b5   :  { %657 = vmatpush3.bf16.msra.mxu1 %v702_v47 }
 0x1b6   :  { %223 = vst.msk [vmem:[#allocation2] sm:$0x1] %vm22_vm2, %v221_v48  ;;  %v703_v48 = vld [vmem:[%s919_s1 + $0x80] sm:$0xff]   ;;  %658 = vmatprep.subr.bf16.mxu1 %v734_v1 }
 0x1b9   :  { %659 = vmatpush3.bf16.msra.mxu1 %v703_v48 }
 0x1bd   :  { %v510_v43 = vld [vmem:[#allocation2] sm:$0x1] }
 0x1be   :  { %v512_v44 = vsel %vm511_vm6, %v510_v43, 0.0  ;;  %v519_v46 = vrot.slane %v510_v43, %v518_v45 }
 0x20f   :  { %v239_v53 = vpop.permute.xlu1 %238 }
 0x210   :  { %v244_v57 = vadd.f32 %v239_v53, %v234_v54 }
 0x212   :  { %v246_v61 = vsub.f32 %v244_v57, %v812_v12  ;;  %v248_v62 = vmul.f32 %v244_v57, %v812_v12 }
 0x213   :  { %v241_v59 = vpop.permute.xlu1 %240 }
 0x214   :  { %v245_v60 = vadd.f32 %v241_v59, %v235_v58  ;;  %v584_v58 = vld [vmem:[%s920_s2 + $0x3] ss:$0 sm:$0xff] }
 0x216   :  { %v247_v63 = vsub.f32 %v245_v60, %v816_v15  ;;  %v249_v0 = vmul.f32 %v245_v60, %v816_v15  ;;  %v670_v2 = vpack.i.bf16 %v245_v60, %v244_v57 }
 0x218   :  { %671 = vrot.lane.b32.xlu0 %v670_v2, %s737_s27  ;;  %v675_v3 = vpack.i.bf16 %v247_v63, %v246_v61  ;;  %v680_v4 = vpack.i.bf16 %v249_v0, %v248_v62  ;;  %v585_v61 = vld [vmem:[%s920_s2 + $0x4] ss:$0 sm:$0xff] }
 0x21a   :  { %676 = vrot.lane.b32.xlu1 %v675_v3, %s738_s28 }
 0x21c   :  { %681 = vrot.lane.b32.xlu0 %v680_v4, %s736_s8 }
 0x28a   :  { %v672_v5 = vpop.permute.xlu0 %671 }
 0x28b   :  { %v674_v6 = vunpack.i.h.bf16 %v672_v5  ;;  %v673_v7 = vunpack.i.l.bf16 %v672_v5 }
 0x28c   :  { %v677_v8 = vpop.permute.xlu1 %676 }
 0x28d   :  { %v276_v9 = vsel %vm274_vm4, %v816_v15, %v674_v6  ;;  %v275_v10 = vsel %vm274_vm4, %v812_v12, %v673_v7  ;;  %v679_v11 = vunpack.i.h.bf16 %v677_v8  ;;  %v678_v13 = vunpack.i.l.bf16 %v677_v8  ;;  %v575_v15 = vld [vmem:[%s920_s2 + $0x2] ss:$0 sm:$0xff] }
 0x28e   :  { %v682_v14 = vpop.permute.xlu0 %681 }
 0x28f   :  { %v278_v16 = vsel %vm68_vm1, %v276_v9, %v679_v11  ;;  %v277_v17 = vsel %vm68_vm1, %v275_v10, %v678_v13  ;;  %v684_v18 = vunpack.i.h.bf16 %v682_v14  ;;  %v683_v20 = vunpack.i.l.bf16 %v682_v14 }
 0x291   :  { %v280_v21 = vsel %vm279_vm5, %v277_v17, %v683_v20  ;;  %v281_v22 = vsel %vm279_vm5, %v278_v16, %v684_v18 }
 0x292   :  { %v282_v23 = vpack.c.bf16 %v281_v22, %v280_v21 }
 0x294   :  { %653 = vmatmul.mubr.bf16.vlgmr.msra.gmra.mxu0 %v282_v23 }
 0x354   :  { %v386_v24 = vpop.f32.mrf.mxu0 }
 0x355   :  { %v387_v12 = vadd.f32 %v575_v15, %v386_v24 }
 0x356   :  { %v654_v25 = vpop.f32.mrf.mxu0 }
 0x357   :  { %v393_v26 = vmax.f32 %v387_v12, 0.0 }
 0x358   :  { %v389_v27 = vpop.f32.mrf.mxu0 }
 0x359   :  { %v390_v28 = vadd.f32 %v575_v15, %v389_v27  ;;  %v395_v29 = vsel %vm274_vm4, %v393_v26, 0.0 }
 0x35a   :  { %396 = vadd.xlane.f32.xlu1 %v395_v29  ;;  %v655_v30 = vpop.f32.mrf.mxu0 }
 0x35b   :  { %v394_v31 = vmax.f32 %v390_v28, 0.0 }
 0x35d   :  { %v398_v32 = vsel %vm274_vm4, %v394_v31, 0.0 }
 0x35e   :  { %399 = vadd.xlane.f32.xlu0 %v398_v32 }
 0x3e3   :  { %v397_v33 = vpop.xlane.xlu1 %396 }
 0x3e4   :  { %v402_v34 = vmul.f32 0.03125, %v397_v33 }
 0x3e6   :  { %v404_v35 = vsub.f32 %v393_v26, %v402_v34 }
 0x3e7   :  { %v400_v36 = vpop.xlane.xlu0 %399 }
 0x3e8   :  { %v403_v37 = vmul.f32 0.03125, %v400_v36  ;;  %v406_v38 = vmul.f32 %v404_v35, %v404_v35 }
 0x3ea   :  { %v405_v39 = vsub.f32 %v394_v31, %v403_v37  ;;  %v408_v40 = vsel %vm274_vm4, %v406_v38, 0.0 }
 0x3eb   :  { %409 = vadd.xlane.f32.xlu0 %v408_v40 }
 0x3ec   :  { %v407_v41 = vmul.f32 %v405_v39, %v405_v39 }
 0x3ee   :  { %v411_v42 = vsel %vm274_vm4, %v407_v41, 0.0 }
 0x3ef   :  { %412 = vadd.xlane.f32.xlu1 %v411_v42 }
 0x3f3   :  { %513 = vadd.xlane.f32.xlu1 %v512_v44 }
 0x401   :  { %520 = vrot.lane.b32.xlu0 %v519_v46, %s736_s8 }
 0x474   :  { %v410_v49 = vpop.xlane.xlu0 %409 }
 0x475   :  { %v414_v50 = vmul.f32 0.03125, %v410_v49 }
 0x477   :  { %v416_v51 = vadd.f32 1e-05, %v414_v50 }
 0x478   :  { %v413_v52 = vpop.xlane.xlu1 %412  ;;  %v521_v19 = vpop.permute.xlu0 %520 }
 0x479   :  { %704 = vrsqrt.f32 %v416_v51  ;;  %v415_v53 = vmul.f32 0.03125, %v413_v52  ;;  %v523_v54 = vsel %vm511_vm6, %v521_v19, 0.0 }
 0x47a   :  { %524 = vadd.xlane.f32.xlu1 %v523_v54 }
 0x47b   :  { %v417_v55 = vadd.f32 1e-05, %v415_v53 }
 0x47c   :  { %v514_v3 = vpop.xlane.xlu1 %513 }
 0x47d   :  { %706 = vrsqrt.f32 %v417_v55  ;;  %vm528_vm7 = vcmp.eq.f32.partialorder %v514_v3, inf  ;;  %v531_v11 = vand.u32 2147483648, %v514_v3  ;;  %vm530_vm9 = vcmp.eq.f32.partialorder %v514_v3, 0.0 }
 0x47e   :  { %708 = vrsqrt.f32 %v514_v3 }
 0x486   :  { %v705_v56 = vpop.eup %704 }
 0x487   :  { %v420_v57 = vmul.f32 %v705_v56, %v404_v35 }
 0x489   :  { %v427_v60 = vmul.f32 %v584_v58, %v420_v57 }
 0x48a   :  { %v707_v1 = vpop.eup %706 }
 0x48b   :  { %v421_v59 = vmul.f32 %v707_v1, %v405_v39  ;;  %v434_v63 = vadd.f32 %v585_v61, %v427_v60  ;;  %v709_v5 = vpop.eup %708 }
 0x48c   :  { %v527_v6 = vmul.f32 %v709_v5, %v514_v3 }
 0x48d   :  { %v428_v62 = vmul.f32 %v584_v58, %v421_v59 }
 0x48e   :  { %v529_v9 = vsel %vm528_vm7, %v514_v3, %v527_v6 }
 0x48f   :  { %v435_v0 = vadd.f32 %v585_v61, %v428_v62  ;;  %v532_v14 = vsel %vm530_vm9, %v531_v11, %v529_v9 }
 0x491   :  { %v436_v2 = vpack.c.bf16 %v435_v0, %v434_v63 }
 0x493   :  { %661 = vmatmul.mubr.msk.bf16.vlgmr.msra.gmra.mxu1 %vm274_vm4, %v436_v2 }
 0x503   :  { %v525_v4 = vpop.xlane.xlu1 %524 }
 0x504   :  { %710 = vrsqrt.f32 %v525_v4  ;;  %vm535_vm8 = vcmp.eq.f32.partialorder %v525_v4, inf  ;;  %v538_v10 = vand.u32 2147483648, %v525_v4  ;;  %vm537_vm10 = vcmp.eq.f32.partialorder %v525_v4, 0.0 }
 0x511   :  { %v711_v7 = vpop.eup %710 }
 0x512   :  { %v534_v8 = vmul.f32 %v711_v7, %v525_v4 }
 0x514   :  { %v536_v13 = vsel %vm535_vm8, %v525_v4, %v534_v8 }
 0x515   :  { %v539_v16 = vsel %vm537_vm10, %v538_v10, %v536_v13 }
 0x516   :  { %v540_v17 = vadd.f32 %v539_v16, %v532_v14 }
 0x518   :  { %542 = vst.msk [vmem:[#allocation3] sm:$0x1] %vm541_vm11, %v540_v17 }
 0x519   :  { %723 = shalt.err (!%p720_p4)
}
 0x51a   :  { %554 = dma.vmem_to_hbm [thread:$0]  %s552_s12, 16, %s922_s4, [#allocation4]   ;;  %v586_v18 = vld [vmem:[%s920_s2 + $0x5] ss:$0 sm:$0xff]  ;;  %vm504_vm12 = vcmask 15360  }
 0x553   :  { %v495_v20 = vpop.f32.mrf.mxu1 }
 0x554   :  { %v496_v21 = vadd.f32 %v586_v18, %v495_v20 }
 0x555   :  { %v662_v22 = vpop.f32.mrf.mxu1 }
 0x556   :  { %v502_v23 = vmax.f32 %v496_v21, 0.0 }
 0x557   :  { %v498_v15 = vpop.f32.mrf.mxu1 }
 0x558   :  { %505 = vst.msk [vmem:[%s921_s3] sm:$0xff] %vm504_vm12, %v502_v23  ;;  %v499_v24 = vadd.f32 %v586_v18, %v498_v15 }
 0x559   :  { %v663_v12 = vpop.f32.mrf.mxu1 }
 0x55a   :  { %v503_v25 = vmax.f32 %v499_v24, 0.0 }
 0x55c   :  { %506 = vst.msk [vmem:[%s921_s3 + $0x8] sm:$0xff] %vm504_vm12, %v503_v25 }
 0x55d   :  { %732 = dma.done.wait [#allocation4], 16  }
 0x55e   :  { %733 = vsyncadd [#allocation4], 4294967280 }
 0x55f   :  { %560 = vsyncpa [#allocation4], 1 }

</bundles_post_ra>
